<compile_context>
chip_gen: v7x
topology: tpu7x:2x2x1
jax: 0.10.0
libtpu: 0.0.40
codegen_flags: <defaults>
</compile_context>

<pallas_src>
import functools

import jax
import jax.numpy as jnp
from jax import lax
from jax.experimental import pallas as pl
from jax.experimental.pallas import tpu as pltpu

EPS = 1e-5  # nn.LayerNorm default


def _round_up(n, m):
    return ((n + m - 1) // m) * m


def _vmem_plan():
    """(trigger_default, cap) for the scoped-VMEM limit, per chip generation."""
    physical = 128 << 20
    try:
        physical = int(pltpu.get_tpu_info().vmem_capacity_bytes)
    except Exception:
        pass
    # Trigger against the smallest default scoped limit across generations
    # (v5e = 16 MiB); cap leaves headroom below physical VMEM.
    default_scoped = 16 << 20
    cap = (48 << 20) if physical <= (64 << 20) else (100 << 20)
    return default_scoped, cap


def _pick_tn(d_out_pad, k_pad, w_itemsize, max_weight_block_bytes=8 << 20):
    """Output-column tile: full width unless the fused weight is huge."""
    if k_pad * d_out_pad * w_itemsize <= max_weight_block_bytes:
        return d_out_pad
    best = 128
    cand = 128
    while cand <= d_out_pad:
        if d_out_pad % cand == 0 and k_pad * cand * w_itemsize <= max_weight_block_bytes:
            best = cand
        cand += 128
    return best


def _prenorm_fused_kernel(x_ref, c_ref, w_ref, bias_ref, o_ref,
                          *, d_x, d_c, d_x_pad, d_c_pad):
    mm_dtype = w_ref.dtype

    # ---- LayerNorm(x): centered two-pass variance over the REAL d_x features.
    # Padded lane columns of the input are zero, so the mean is exact; their
    # centered value is -mu and the correction below removes their exact
    # contribution from the sum of squares.
    x = x_ref[...].astype(jnp.float32)
    mu_x = jnp.sum(x, axis=-1, keepdims=True) * (1.0 / d_x)
    xc = x - mu_x
    ssq_x = jnp.sum(xc * xc, axis=-1, keepdims=True)
    if d_x_pad > d_x:  # static Python branch
        ssq_x = ssq_x - (d_x_pad - d_x) * (mu_x * mu_x)
    xh = xc * lax.rsqrt(ssq_x * (1.0 / d_x) + EPS)

    # ---- LayerNorm(context) ----
    c = c_ref[...].astype(jnp.float32)
    mu_c = jnp.sum(c, axis=-1, keepdims=True) * (1.0 / d_c)
    cc = c - mu_c
    ssq_c = jnp.sum(cc * cc, axis=-1, keepdims=True)
    if d_c_pad > d_c:  # static Python branch
        ssq_c = ssq_c - (d_c_pad - d_c) * (mu_c * mu_c)
    ch = cc * lax.rsqrt(ssq_c * (1.0 / d_c) + EPS)

    # gamma/beta are folded into w_ref / bias_ref on the host.  Two MXU dots
    # against static slices of the fused weight, accumulated in f32.  Garbage
    # in padded lanes of xh/ch multiplies exactly-zero weight rows, so it never
    # reaches the output.
    out = jnp.dot(xh.astype(mm_dtype), w_ref[:d_x_pad, :],
                  preferred_element_type=jnp.float32)
    out = out + jnp.dot(ch.astype(mm_dtype), w_ref[d_x_pad:, :],
                        preferred_element_type=jnp.float32)
    o_ref[...] = (out + bias_ref[...]).astype(o_ref.dtype)


def prenorm_apply(x, context, params, *, block_rows=512,
                  matmul_dtype=jnp.bfloat16):
    """x: (B, S, D); context: (B, S, Dc). Returns (B, S, D)."""
    B, S, D = x.shape
    Bc, Sc, Dc = context.shape
    assert (Bc, Sc) == (B, S), "synthetic fn adds x/context projections row-wise"

    rows = B * S
    # Lane-dense feature layout: every feature dim padded to a multiple of 128.
    Dp = _round_up(D, 128)
    Dcp = _round_up(Dc, 128)
    Dop = Dp                      # output feature dim == D, padded identically
    Kp = Dp + Dcp
    w_itemsize = jnp.dtype(matmul_dtype).itemsize
    io_itemsize = jnp.dtype(x.dtype).itemsize

    # ---- row tile: multiple of 16, prefer dividing `rows` exactly (avoids the
    # host-side row-pad copy), prefer an even step count (v7x megacore). ----
    br = max(16, min(_round_up(block_rows, 16), _round_up(rows, 16)))
    if rows % 16 == 0 and rows % br != 0:
        cand = br
        while cand > 16 and rows % cand != 0:
            cand -= 16
        br = cand
    nsteps = pl.cdiv(rows, br)
    if nsteps > 1 and nsteps % 2 == 1 and br % 32 == 0:
        br //= 2
    rows_pad = _round_up(rows, br)
    n_row_steps = rows_pad // br

    # ---- output-column tiling (only kicks in for very large fused weights) --
    tn = _pick_tn(Dop, Kp, w_itemsize)
    n_col_steps = Dop // tn

    # ---- host-side layout; skip the pad copy when already aligned ----------
    def _prep(a2d, dpad):
        r, d = a2d.shape
        if r == rows_pad and d == dpad:
            return a2d
        return jnp.zeros((rows_pad, dpad), a2d.dtype).at[:r, :d].set(a2d)

    x2 = _prep(x.reshape(rows, D), Dp)
    c2 = _prep(context.reshape(rows, Dc), Dcp)

    # Fold the LayerNorm affines into the projection:
    #   xn @ Wx + cn @ Wc + b
    # = (x-mu)*rs @ (diag(gx) Wx) + (c-mu)*rs @ (diag(gc) Wc)
    #   + (bx @ Wx + bc @ Wc + b)
    wx = params["gamma_x"][:, None] * params["w_x"]          # (D,  D)
    wc = params["gamma_c"][:, None] * params["w_c"]          # (Dc, D)
    w = jnp.zeros((Kp, Dop), jnp.float32)
    w = w.at[:D, :D].set(wx).at[Dp:Dp + Dc, :D].set(wc)
    w = w.astype(matmul_dtype)
    bias_fused = (params["beta_x"] @ params["w_x"]
                  + params["beta_c"] @ params["w_c"] + params["bias"])
    bias = jnp.zeros((1, Dop), jnp.float32).at[0, :D].set(bias_fused)

    grid = (n_row_steps, n_col_steps)
    kernel = functools.partial(_prenorm_fused_kernel,
                               d_x=D, d_c=Dc, d_x_pad=Dp, d_c_pad=Dcp)

    # ---- VMEM budgeting (per-generation trigger + cap) ----------------------
    w_bufs = 1 if n_col_steps == 1 else 2
    est = (2 * br * Dp * io_itemsize            # x tile, double-buffered
           + 2 * br * Dcp * io_itemsize         # ctx tile, double-buffered
           + 2 * br * tn * io_itemsize          # out tile, double-buffered
           + w_bufs * Kp * tn * w_itemsize      # fused weight
           + w_bufs * tn * 4                    # fused bias
           + 4 * br * max(Dp, Dcp) * 4)         # f32 in-kernel temporaries
    default_scoped, cap = _vmem_plan()
    compiler_kwargs = dict(dimension_semantics=("parallel", "parallel"))
    if est > (default_scoped * 3) // 4:
        compiler_kwargs["vmem_limit_bytes"] = int(
            min(_round_up(est, 1 << 20) + (8 << 20), cap))

    flops = 2 * rows_pad * Kp * Dop
    bytes_accessed = int(x2.size * io_itemsize + c2.size * io_itemsize
                         + w.size * w_itemsize + bias.size * 4
                         + rows_pad * Dop * io_itemsize)

    def _build(single_buffer_const):
        const_kw = ({} if (not single_buffer_const or n_col_steps > 1)
                    else dict(pipeline_mode=pl.Buffered(1)))
        in_specs = [
            pl.BlockSpec((br, Dp), lambda i, j: (i, 0)),           # x rows
            pl.BlockSpec((br, Dcp), lambda i, j: (i, 0)),          # ctx rows
            pl.BlockSpec((Kp, tn), lambda i, j: (0, j), **const_kw),   # fused W
            pl.BlockSpec((1, tn), lambda i, j: (0, j), **const_kw),    # fused b
        ]
        return pl.pallas_call(
            kernel,
            out_shape=jax.ShapeDtypeStruct((rows_pad, Dop), x.dtype),
            grid_spec=pltpu.PrefetchScalarGridSpec(
                num_scalar_prefetch=0,
                grid=grid,
                in_specs=in_specs,
                out_specs=pl.BlockSpec((br, tn), lambda i, j: (i, j)),
            ),
            compiler_params=pltpu.CompilerParams(**compiler_kwargs),
            cost_estimate=pl.CostEstimate(flops=flops,
                                          transcendentals=2 * rows_pad,
                                          bytes_accessed=bytes_accessed),
        )

    try:
        out = _build(True)(x2, c2, w, bias)
    except Exception:
        # Defensive fallback: some toolchains may reject Buffered(1); retry
        # with default double-buffering (correctness identical).
        out = _build(False)(x2, c2, w, bias)

    return out[:rows, :D].reshape(B, S, D)


def make_params(key, dim, context_dim):
    ks = jax.random.split(key, 7)
    return {
        # nn.LayerNorm affine params (non-trivial but deterministic)
        "gamma_x": 1.0 + 0.1 * jax.random.normal(ks[0], (dim,), jnp.float32),
        "beta_x": 0.1 * jax.random.normal(ks[1], (dim,), jnp.float32),
        "gamma_c": 1.0 + 0.1 * jax.random.normal(ks[2], (context_dim,), jnp.float32),
        "beta_c": 0.1 * jax.random.normal(ks[3], (context_dim,), jnp.float32),
        # synthetic wrapped fn: Linear-style projections
        "w_x": jax.random.normal(ks[4], (dim, dim), jnp.float32) / jnp.sqrt(dim),
        "w_c": jax.random.normal(ks[5], (context_dim, dim), jnp.float32) / jnp.sqrt(context_dim),
        "bias": 0.01 * jax.random.normal(ks[6], (dim,), jnp.float32),
    }


def prenorm_ref(x, context, p):
    """Pure-JAX f32 reference (matches the PyTorch module semantics)."""
    def ln(v, g, b):
        mu = jnp.mean(v, -1, keepdims=True)
        var = jnp.mean((v - mu) ** 2, -1, keepdims=True)
        return (v - mu) / jnp.sqrt(var + EPS) * g + b
    xn = ln(x, p["gamma_x"], p["beta_x"])
    cn = ln(context, p["gamma_c"], p["beta_c"])
    return xn @ p["w_x"] + cn @ p["w_c"] + p["bias"]


if __name__ == "__main__":
    B, S, D, Dc = 2, 8, 32, 16
    key = jax.random.PRNGKey(0)
    kx, kc, kp = jax.random.split(key, 3)
    x = jax.random.normal(kx, (B, S, D), jnp.float32)
    context = jax.random.normal(kc, (B, S, Dc), jnp.float32)
    params = make_params(kp, D, Dc)

    out = prenorm_apply(x, context, params)
    out = jax.block_until_ready(out)

    ref = prenorm_ref(x, context, params)
    assert out.shape == (B, S, D)
    # Matmul operands are bf16 (f32 accumulation), so tolerance is bf16-scaled.
    assert jnp.allclose(out, ref, atol=5e-2, rtol=5e-2), "mismatch vs reference"
    print("KERNEL_OK")
</pallas_src>

<mosaic_0001>
module attributes {stable_mosaic.version = 11 : i64} {
  func.func @_prenorm_fused_kernel(%arg0: i32, %arg1: i32, %arg2: memref<16x128xf32, #tpu.memory_space<vmem>>, %arg3: memref<16x128xf32, #tpu.memory_space<vmem>>, %arg4: memref<256x128xbf16, #tpu.memory_space<vmem>>, %arg5: memref<1x128xf32, #tpu.memory_space<vmem>>, %arg6: memref<16x128xf32, #tpu.memory_space<vmem>>) attributes {dimension_semantics = [#tpu.dimension_semantics<parallel>, #tpu.dimension_semantics<parallel>], iteration_bounds = array<i64: 1, 1>, scalar_prefetch = 0 : i64, scratch_operands = 0 : i64, tpu.core_type = #tpu.core_type<tc>, window_params = [{transform_indices = @transform_0, window_bounds = array<i64: 16, 128>}, {transform_indices = @transform_1, window_bounds = array<i64: 16, 128>}, {pipeline_mode = #tpu.pipeline_mode<synchronous>, transform_indices = @transform_2, window_bounds = array<i64: 256, 128>}, {pipeline_mode = #tpu.pipeline_mode<synchronous>, transform_indices = @transform_3, window_bounds = array<i64: 1, 128>}, {transform_indices = @transform_4, window_bounds = array<i64: 16, 128>}]} {
    %c0 = arith.constant 0 : index
    %c0_0 = arith.constant 0 : index
    %0 = vector.load %arg2[%c0, %c0_0] : memref<16x128xf32, #tpu.memory_space<vmem>>, vector<16x128xf32>
    %cst = arith.constant dense<0.000000e+00> : vector<16xf32>
    %1 = vector.multi_reduction <add>, %0, %cst [1] : vector<16x128xf32> to vector<16xf32>
    %2 = vector.shape_cast %1 : vector<16xf32> to vector<16x1xf32>
    %cst_1 = arith.constant 3.125000e-02 : f32
    %3 = vector.broadcast %cst_1 : f32 to vector<16x1xf32>
    %4 = arith.mulf %2, %3 : vector<16x1xf32>
    %5 = vector.broadcast %4 : vector<16x1xf32> to vector<16x128xf32>
    %6 = arith.subf %0, %5 : vector<16x128xf32>
    %7 = arith.mulf %6, %6 : vector<16x128xf32>
    %cst_2 = arith.constant dense<0.000000e+00> : vector<16xf32>
    %8 = vector.multi_reduction <add>, %7, %cst_2 [1] : vector<16x128xf32> to vector<16xf32>
    %9 = vector.shape_cast %8 : vector<16xf32> to vector<16x1xf32>
    %10 = arith.mulf %4, %4 : vector<16x1xf32>
    %cst_3 = arith.constant 9.600000e+01 : f32
    %11 = vector.broadcast %cst_3 : f32 to vector<16x1xf32>
    %12 = arith.mulf %11, %10 : vector<16x1xf32>
    %13 = arith.subf %9, %12 : vector<16x1xf32>
    %cst_4 = arith.constant 3.125000e-02 : f32
    %14 = vector.broadcast %cst_4 : f32 to vector<16x1xf32>
    %15 = arith.mulf %13, %14 : vector<16x1xf32>
    %cst_5 = arith.constant 9.99999974E-6 : f32
    %16 = vector.broadcast %cst_5 : f32 to vector<16x1xf32>
    %17 = arith.addf %15, %16 : vector<16x1xf32>
    %18 = math.rsqrt %17 : vector<16x1xf32>
    %19 = vector.broadcast %18 : vector<16x1xf32> to vector<16x128xf32>
    %20 = arith.mulf %6, %19 : vector<16x128xf32>
    %c0_6 = arith.constant 0 : index
    %c0_7 = arith.constant 0 : index
    %21 = vector.load %arg3[%c0_6, %c0_7] : memref<16x128xf32, #tpu.memory_space<vmem>>, vector<16x128xf32>
    %cst_8 = arith.constant dense<0.000000e+00> : vector<16xf32>
    %22 = vector.multi_reduction <add>, %21, %cst_8 [1] : vector<16x128xf32> to vector<16xf32>
    %23 = vector.shape_cast %22 : vector<16xf32> to vector<16x1xf32>
    %cst_9 = arith.constant 6.250000e-02 : f32
    %24 = vector.broadcast %cst_9 : f32 to vector<16x1xf32>
    %25 = arith.mulf %23, %24 : vector<16x1xf32>
    %26 = vector.broadcast %25 : vector<16x1xf32> to vector<16x128xf32>
    %27 = arith.subf %21, %26 : vector<16x128xf32>
    %28 = arith.mulf %27, %27 : vector<16x128xf32>
    %cst_10 = arith.constant dense<0.000000e+00> : vector<16xf32>
    %29 = vector.multi_reduction <add>, %28, %cst_10 [1] : vector<16x128xf32> to vector<16xf32>
    %30 = vector.shape_cast %29 : vector<16xf32> to vector<16x1xf32>
    %31 = arith.mulf %25, %25 : vector<16x1xf32>
    %cst_11 = arith.constant 1.120000e+02 : f32
    %32 = vector.broadcast %cst_11 : f32 to vector<16x1xf32>
    %33 = arith.mulf %32, %31 : vector<16x1xf32>
    %34 = arith.subf %30, %33 : vector<16x1xf32>
    %cst_12 = arith.constant 6.250000e-02 : f32
    %35 = vector.broadcast %cst_12 : f32 to vector<16x1xf32>
    %36 = arith.mulf %34, %35 : vector<16x1xf32>
    %cst_13 = arith.constant 9.99999974E-6 : f32
    %37 = vector.broadcast %cst_13 : f32 to vector<16x1xf32>
    %38 = arith.addf %36, %37 : vector<16x1xf32>
    %39 = math.rsqrt %38 : vector<16x1xf32>
    %40 = vector.broadcast %39 : vector<16x1xf32> to vector<16x128xf32>
    %41 = arith.mulf %27, %40 : vector<16x128xf32>
    %42 = arith.truncf %20 : vector<16x128xf32> to vector<16x128xbf16>
    %c0_14 = arith.constant 0 : index
    %c0_15 = arith.constant 0 : index
    %43 = vector.load %arg4[%c0_14, %c0_15] : memref<256x128xbf16, #tpu.memory_space<vmem>>, vector<128x128xbf16>
    %cst_16 = arith.constant dense<0.000000e+00> : vector<16x128xf32>
    %44 = tpu.matmul %42, %43, %cst_16 {dimension_numbers = #tpu.dot_dimension_numbers<[1], [0], [0], [1], [0, 0, 1, 1], [], []>} : vector<16x128xbf16>, vector<128x128xbf16>, vector<16x128xf32> -> vector<16x128xf32>
    %45 = arith.truncf %41 : vector<16x128xf32> to vector<16x128xbf16>
    %c128 = arith.constant 128 : index
    %c0_17 = arith.constant 0 : index
    %46 = vector.load %arg4[%c128, %c0_17] : memref<256x128xbf16, #tpu.memory_space<vmem>>, vector<128x128xbf16>
    %cst_18 = arith.constant dense<0.000000e+00> : vector<16x128xf32>
    %47 = tpu.matmul %45, %46, %cst_18 {dimension_numbers = #tpu.dot_dimension_numbers<[1], [0], [0], [1], [0, 0, 1, 1], [], []>} : vector<16x128xbf16>, vector<128x128xbf16>, vector<16x128xf32> -> vector<16x128xf32>
    %48 = arith.addf %44, %47 : vector<16x128xf32>
    %c0_19 = arith.constant 0 : index
    %c0_20 = arith.constant 0 : index
    %49 = vector.load %arg5[%c0_19, %c0_20] : memref<1x128xf32, #tpu.memory_space<vmem>>, vector<1x128xf32>
    %50 = vector.broadcast %49 : vector<1x128xf32> to vector<16x128xf32>
    %51 = arith.addf %48, %50 : vector<16x128xf32>
    %c0_21 = arith.constant 0 : index
    %c0_22 = arith.constant 0 : index
    %52 = vector.load %arg6[%c0_21, %c0_22] : memref<16x128xf32, #tpu.memory_space<vmem>>, vector<16x128xf32>
    tpu.vector_store %arg6[%c0_21, %c0_22], %51 {strides = array<i32>} : memref<16x128xf32, #tpu.memory_space<vmem>>, vector<16x128xf32>,
    return
  }
  func.func @transform_0(%arg0: i32, %arg1: i32) -> (i32, i32) {
    %c0_i32 = arith.constant 0 : i32
    %c0_i32_0 = arith.constant 0 : i32
    return %arg0, %c0_i32 : i32, i32
  }
  func.func @transform_1(%arg0: i32, %arg1: i32) -> (i32, i32) {
    %c0_i32 = arith.constant 0 : i32
    %c0_i32_0 = arith.constant 0 : i32
    return %arg0, %c0_i32 : i32, i32
  }
  func.func @transform_2(%arg0: i32, %arg1: i32) -> (i32, i32) {
    %c0_i32 = arith.constant 0 : i32
    %c0_i32_0 = arith.constant 0 : i32
    return %c0_i32, %arg1 : i32, i32
  }
  func.func @transform_3(%arg0: i32, %arg1: i32) -> (i32, i32) {
    %c0_i32 = arith.constant 0 : i32
    %c0_i32_0 = arith.constant 0 : i32
    return %c0_i32, %arg1 : i32, i32
  }
  func.func @transform_4(%arg0: i32, %arg1: i32) -> (i32, i32) {
    %c0_i32 = arith.constant 0 : i32
    return %arg0, %arg1 : i32, i32
  }
}

module attributes {stable_mosaic.version = 11 : i64} {
  func.func @_prenorm_fused_kernel(%arg0: i32, %arg1: i32, %arg2: memref<16x128xf32, #tpu.memory_space<vmem>>, %arg3: memref<16x128xf32, #tpu.memory_space<vmem>>, %arg4: memref<256x128xbf16, #tpu.memory_space<vmem>>, %arg5: memref<1x128xf32, #tpu.memory_space<vmem>>, %arg6: memref<16x128xf32, #tpu.memory_space<vmem>>) attributes {dimension_semantics = [#tpu.dimension_semantics<parallel>, #tpu.dimension_semantics<parallel>], iteration_bounds = array<i64: 1, 1>, scalar_prefetch = 0 : i64, scratch_operands = 0 : i64, tpu.core_type = #tpu.core_type<tc>, window_params = [{transform_indices = @transform_0, window_bounds = array<i64: 16, 128>}, {transform_indices = @transform_1, window_bounds = array<i64: 16, 128>}, {transform_indices = @transform_2, window_bounds = array<i64: 256, 128>}, {transform_indices = @transform_3, window_bounds = array<i64: 1, 128>}, {transform_indices = @transform_4, window_bounds = array<i64: 16, 128>}]} {
    %c0 = arith.constant 0 : index
    %c0_0 = arith.constant 0 : index
    %0 = vector.load %arg2[%c0, %c0_0] : memref<16x128xf32, #tpu.memory_space<vmem>>, vector<16x128xf32>
    %cst = arith.constant dense<0.000000e+00> : vector<16xf32>
    %1 = vector.multi_reduction <add>, %0, %cst [1] : vector<16x128xf32> to vector<16xf32>
    %2 = vector.shape_cast %1 : vector<16xf32> to vector<16x1xf32>
    %cst_1 = arith.constant 3.125000e-02 : f32
    %3 = vector.broadcast %cst_1 : f32 to vector<16x1xf32>
    %4 = arith.mulf %2, %3 : vector<16x1xf32>
    %5 = vector.broadcast %4 : vector<16x1xf32> to vector<16x128xf32>
    %6 = arith.subf %0, %5 : vector<16x128xf32>
    %7 = arith.mulf %6, %6 : vector<16x128xf32>
    %cst_2 = arith.constant dense<0.000000e+00> : vector<16xf32>
    %8 = vector.multi_reduction <add>, %7, %cst_2 [1] : vector<16x128xf32> to vector<16xf32>
    %9 = vector.shape_cast %8 : vector<16xf32> to vector<16x1xf32>
    %10 = arith.mulf %4, %4 : vector<16x1xf32>
    %cst_3 = arith.constant 9.600000e+01 : f32
    %11 = vector.broadcast %cst_3 : f32 to vector<16x1xf32>
    %12 = arith.mulf %11, %10 : vector<16x1xf32>
    %13 = arith.subf %9, %12 : vector<16x1xf32>
    %cst_4 = arith.constant 3.125000e-02 : f32
    %14 = vector.broadcast %cst_4 : f32 to vector<16x1xf32>
    %15 = arith.mulf %13, %14 : vector<16x1xf32>
    %cst_5 = arith.constant 9.99999974E-6 : f32
    %16 = vector.broadcast %cst_5 : f32 to vector<16x1xf32>
    %17 = arith.addf %15, %16 : vector<16x1xf32>
    %18 = math.rsqrt %17 : vector<16x1xf32>
    %19 = vector.broadcast %18 : vector<16x1xf32> to vector<16x128xf32>
    %20 = arith.mulf %6, %19 : vector<16x128xf32>
    %c0_6 = arith.constant 0 : index
    %c0_7 = arith.constant 0 : index
    %21 = vector.load %arg3[%c0_6, %c0_7] : memref<16x128xf32, #tpu.memory_space<vmem>>, vector<16x128xf32>
    %cst_8 = arith.constant dense<0.000000e+00> : vector<16xf32>
    %22 = vector.multi_reduction <add>, %21, %cst_8 [1] : vector<16x128xf32> to vector<16xf32>
    %23 = vector.shape_cast %22 : vector<16xf32> to vector<16x1xf32>
    %cst_9 = arith.constant 6.250000e-02 : f32
    %24 = vector.broadcast %cst_9 : f32 to vector<16x1xf32>
    %25 = arith.mulf %23, %24 : vector<16x1xf32>
    %26 = vector.broadcast %25 : vector<16x1xf32> to vector<16x128xf32>
    %27 = arith.subf %21, %26 : vector<16x128xf32>
    %28 = arith.mulf %27, %27 : vector<16x128xf32>
    %cst_10 = arith.constant dense<0.000000e+00> : vector<16xf32>
    %29 = vector.multi_reduction <add>, %28, %cst_10 [1] : vector<16x128xf32> to vector<16xf32>
    %30 = vector.shape_cast %29 : vector<16xf32> to vector<16x1xf32>
    %31 = arith.mulf %25, %25 : vector<16x1xf32>
    %cst_11 = arith.constant 1.120000e+02 : f32
    %32 = vector.broadcast %cst_11 : f32 to vector<16x1xf32>
    %33 = arith.mulf %32, %31 : vector<16x1xf32>
    %34 = arith.subf %30, %33 : vector<16x1xf32>
    %cst_12 = arith.constant 6.250000e-02 : f32
    %35 = vector.broadcast %cst_12 : f32 to vector<16x1xf32>
    %36 = arith.mulf %34, %35 : vector<16x1xf32>
    %cst_13 = arith.constant 9.99999974E-6 : f32
    %37 = vector.broadcast %cst_13 : f32 to vector<16x1xf32>
    %38 = arith.addf %36, %37 : vector<16x1xf32>
    %39 = math.rsqrt %38 : vector<16x1xf32>
    %40 = vector.broadcast %39 : vector<16x1xf32> to vector<16x128xf32>
    %41 = arith.mulf %27, %40 : vector<16x128xf32>
    %42 = arith.truncf %20 : vector<16x128xf32> to vector<16x128xbf16>
    %c0_14 = arith.constant 0 : index
    %c0_15 = arith.constant 0 : index
    %43 = vector.load %arg4[%c0_14, %c0_15] : memref<256x128xbf16, #tpu.memory_space<vmem>>, vector<128x128xbf16>
    %cst_16 = arith.constant dense<0.000000e+00> : vector<16x128xf32>
    %44 = tpu.matmul %42, %43, %cst_16 {dimension_numbers = #tpu.dot_dimension_numbers<[1], [0], [0], [1], [0, 0, 1, 1], [], []>} : vector<16x128xbf16>, vector<128x128xbf16>, vector<16x128xf32> -> vector<16x128xf32>
    %45 = arith.truncf %41 : vector<16x128xf32> to vector<16x128xbf16>
    %c128 = arith.constant 128 : index
    %c0_17 = arith.constant 0 : index
    %46 = vector.load %arg4[%c128, %c0_17] : memref<256x128xbf16, #tpu.memory_space<vmem>>, vector<128x128xbf16>
    %cst_18 = arith.constant dense<0.000000e+00> : vector<16x128xf32>
    %47 = tpu.matmul %45, %46, %cst_18 {dimension_numbers = #tpu.dot_dimension_numbers<[1], [0], [0], [1], [0, 0, 1, 1], [], []>} : vector<16x128xbf16>, vector<128x128xbf16>, vector<16x128xf32> -> vector<16x128xf32>
    %48 = arith.addf %44, %47 : vector<16x128xf32>
    %c0_19 = arith.constant 0 : index
    %c0_20 = arith.constant 0 : index
    %49 = vector.load %arg5[%c0_19, %c0_20] : memref<1x128xf32, #tpu.memory_space<vmem>>, vector<1x128xf32>
    %50 = vector.broadcast %49 : vector<1x128xf32> to vector<16x128xf32>
    %51 = arith.addf %48, %50 : vector<16x128xf32>
    %c0_21 = arith.constant 0 : index
    %c0_22 = arith.constant 0 : index
    %52 = vector.load %arg6[%c0_21, %c0_22] : memref<16x128xf32, #tpu.memory_space<vmem>>, vector<16x128xf32>
    tpu.vector_store %arg6[%c0_21, %c0_22], %51 {strides = array<i32>} : memref<16x128xf32, #tpu.memory_space<vmem>>, vector<16x128xf32>,
    return
  }
  func.func @transform_0(%arg0: i32, %arg1: i32) -> (i32, i32) {
    %c0_i32 = arith.constant 0 : i32
    %c0_i32_0 = arith.constant 0 : i32
    return %arg0, %c0_i32 : i32, i32
  }
  func.func @transform_1(%arg0: i32, %arg1: i32) -> (i32, i32) {
    %c0_i32 = arith.constant 0 : i32
    %c0_i32_0 = arith.constant 0 : i32
    return %arg0, %c0_i32 : i32, i32
  }
  func.func @transform_2(%arg0: i32, %arg1: i32) -> (i32, i32) {
    %c0_i32 = arith.constant 0 : i32
    %c0_i32_0 = arith.constant 0 : i32
    return %c0_i32, %arg1 : i32, i32
  }
  func.func @transform_3(%arg0: i32, %arg1: i32) -> (i32, i32) {
    %c0_i32 = arith.constant 0 : i32
    %c0_i32_0 = arith.constant 0 : i32
    return %c0_i32, %arg1 : i32, i32
  }
  func.func @transform_4(%arg0: i32, %arg1: i32) -> (i32, i32) {
    %c0_i32 = arith.constant 0 : i32
    return %arg0, %arg1 : i32, i32
  }
}

</mosaic_0001>

<bundles_post_ra>
// kernel: tpu_custom_call.1
= control target key start
LH: loop header
LB: loop body
LE: loop exit
PB: predicated region body
PF: predicated region fallthrough
CT: control target
= control target key end

     0   :  { %9 = vsyncpa [#allocation3], 0  ;;  %s704_s0 = inlined_call_operand.hbm [shape: f32[16,128], index: 0, kind: input, shape index: {}]   ;;  %s705_s1 = inlined_call_operand.hbm [shape: f32[16,128], index: 1, kind: input, shape index: {}]   ;;  %s706_s2 = inlined_call_operand.hbm [shape: bf16[256,128], index: 2, kind: input, shape index: {}]   ;;  %s707_s3 = inlined_call_operand.vmem [shape: f32[1,128], index: 3, kind: input, shape index: {}]   ;;  %s708_s4 = inlined_call_operand.hbm [shape: f32[16,128], index: 4, kind: output, shape index: {}]  }
   0x1   :  { %10 = vsyncpa [#allocation6], 0 }
   0x2   :  { %11 = vsyncpa [#allocation4], 0  ;;  %s564_s15 = smov [#allocation5]   ;;  %s565_s17 = smov [#allocation2]  }
   0x3   :  { %s29_s16 = sshll.u32 %s564_s15, 4  ;;  %s17_s18 = sshll.u32 %s565_s17, 4  ;;  %s30_s16 = int_to_ptr.vmem [resolvable:$true] %s29_s16  ;;  %s599_s18 = int_to_ptr.vmem [resolvable:$true] %s17_s18 }
   0x4   :  { %s470_s21 = scalar_lea.hbm %s705_s1, 256 }
   0x5   :  { %p471_p0 = scmp.ne.s32.totalorder %s705_s1, %s470_s21  ;;  %p474_p1 = scmp.lt.u32.totalorder %s470_s21, %s705_s1 }
   0x7   :  { %p476_p2 = pnand %p474_p1, %p471_p0 }
   0x9   :  { %479 = shalt.err (!%p476_p2)
}
   0xa   :  { %s480_s26 = scalar_lea.vmem %s30_s16, 256  ;;  %p485_p4 = scmp.lt.s32.totalorder %s30_s16, %s30_s16 }
   0xb   :  { %p481_p3 = scmp.ne.s32.totalorder %s30_s16, %s480_s26  ;;  %p486_p5 = scmp.lt.s32.totalorder %s480_s26, %s480_s26 }
   0xd   :  { %p487_p6 = por %p486_p5, %p485_p4 }
   0xf   :  { %p488_p7 = pnand %p487_p6, %p481_p3 }
  0x11   :  { %491 = shalt.err (!%p488_p7)
}
  0x12   :  { %s566_s27 = smov 128   ;;  %s567_s28 = smov 8  }
  0x13   :  { %35 = dma.hbm_to_vmem [thread:$0]  %s705_s1, 256, %s30_s16, [#allocation6], %s566_s27, %s566_s27, %s567_s28  }
  0x14   :  { %s492_s7 = scalar_lea.hbm %s704_s0, 256 }
  0x15   :  { %p493_p8 = scmp.ne.s32.totalorder %s704_s0, %s492_s7  ;;  %p496_p9 = scmp.lt.u32.totalorder %s492_s7, %s704_s0 }
  0x17   :  { %p498_p10 = pnand %p496_p9, %p493_p8 }
  0x19   :  { %501 = shalt.err (!%p498_p10)
}
  0x1a   :  { %s502_s12 = scalar_lea.vmem %s599_s18, 256  ;;  %p507_p12 = scmp.lt.s32.totalorder %s599_s18, %s599_s18 }
  0x1b   :  { %p503_p11 = scmp.ne.s32.totalorder %s599_s18, %s502_s12  ;;  %p508_p13 = scmp.lt.s32.totalorder %s502_s12, %s502_s12 }
  0x1d   :  { %p509_p0 = por %p508_p13, %p507_p12 }
  0x1f   :  { %p510_p1 = pnand %p509_p0, %p503_p11 }
  0x21   :  { %513 = shalt.err (!%p510_p1)
}
  0x22   :  { %23 = dma.hbm_to_vmem [thread:$0]  %s704_s0, 256, %s599_s18, [#allocation3], %s566_s27, %s566_s27, %s567_s28  }
  0x23   :  { %s568_s14 = smov [#allocation7]   ;;  %s514_s19 = scalar_lea.hbm %s706_s2, 2048 }
  0x24   :  { %s41_s15 = sshll.u32 %s568_s14, 4  ;;  %p515_p2 = scmp.ne.s32.totalorder %s706_s2, %s514_s19  ;;  %s42_s15 = int_to_ptr.vmem [resolvable:$true] %s41_s15 }
  0x25   :  { %p518_p3 = scmp.lt.u32.totalorder %s514_s19, %s706_s2 }
  0x27   :  { %p520_p4 = pnand %p518_p3, %p515_p2 }
  0x29   :  { %523 = shalt.err (!%p520_p4)
}
  0x2a   :  { %s524_s24 = scalar_lea.vmem %s42_s15, 2048  ;;  %p529_p6 = scmp.lt.s32.totalorder %s42_s15, %s42_s15 }
  0x2b   :  { %p525_p5 = scmp.ne.s32.totalorder %s42_s15, %s524_s24  ;;  %p530_p7 = scmp.lt.s32.totalorder %s524_s24, %s524_s24 }
  0x2d   :  { %p531_p8 = por %p530_p7, %p529_p6 }
  0x2f   :  { %p532_p9 = pnand %p531_p8, %p525_p5 }
  0x31   :  { %535 = shalt.err (!%p532_p9)
}
  0x32   :  { %s569_s0 = smov 64   ;;  %s570_s18 = smov 4  }
  0x33   :  { %47 = dma.hbm_to_vmem [thread:$0]  %s706_s2, 2048, %s42_s15, [#allocation6], %s569_s0, %s569_s0, %s570_s18  }
  0x34   :  { %558 = dma.done.wait [#allocation3], 256  }
  0x35   :  { %559 = vsyncadd [#allocation3], 4294967040 }
  0x36   :  { %560 = dma.done.wait [#allocation6], 2304  }
  0x37   :  { %561 = vsyncadd [#allocation6], 4294964992  ;;  %v60_v0 = vld [vmem:[#allocation2] sm:$0xff]  ;;  %v90_v1 = vld [vmem:[#allocation5] sm:$0xff]  ;;  %v571_v6 = vmov 0.0   ;;  %vm572_vm0 = vmmov 0  }
  0x38   :  { %v61_v2 = vld [vmem:[#allocation2 + $0x8] sm:$0xff]  ;;  %62 = vadd.xlane.f32.xlu0 %v60_v0  ;;  %92 = vadd.xlane.f32.xlu1 %v90_v1  ;;  %v91_v3 = vld [vmem:[#allocation5 + $0x8] sm:$0xff]  ;;  %v446_v4 = vld [vmem:[#allocation7] sm:$0xff]   ;;  %s573_s30 = smov [#allocation8]  }
  0x39   :  { %v447_v5 = vld [vmem:[#allocation7 + $0x40] sm:$0xff]   ;;  %416 = vmatprep.subr.bf16.mxu1 %v571_v6  ;;  %396 = vmatprep.subr.bf16.mxu0 %v571_v6  ;;  %v448_v7 = vld [vmem:[#allocation7 + $0x8] sm:$0xff]   ;;  %v450_v25 = vld [vmem:[#allocation7 + $0x10] sm:$0xff]   ;;  %s348_s5 = sshll.u32 %s573_s30, 4  ;;  %s349_s5 = int_to_ptr.vmem [resolvable:$true] %s348_s5 }
  0x3a   :  { %417 = vmatpush3.bf16.msra.mxu1 %v446_v4  ;;  %397 = vmatpush3.bf16.msra.mxu0 %v447_v5  ;;  %v449_v24 = vld [vmem:[#allocation7 + $0x48] sm:$0xff]   ;;  %v451_v26 = vld [vmem:[#allocation7 + $0x50] sm:$0xff]   ;;  %v452_v27 = vld [vmem:[#allocation7 + $0x18] sm:$0xff]   ;;  %s536_s6 = scalar_lea.vmem %s349_s5, 256  ;;  %p541_p11 = scmp.lt.s32.totalorder %s349_s5, %s349_s5 }
  0x3b   :  { %418 = vmatprep.subr.bf16.mxu1 %v571_v6  ;;  %398 = vmatprep.subr.bf16.mxu0 %v571_v6  ;;  %v453_v28 = vld [vmem:[#allocation7 + $0x58] sm:$0xff]   ;;  %v454_v29 = vld [vmem:[#allocation7 + $0x20] sm:$0xff]   ;;  %v456_v31 = vld [vmem:[#allocation7 + $0x28] sm:$0xff]   ;;  %p537_p10 = scmp.ne.s32.totalorder %s349_s5, %s536_s6  ;;  %p542_p12 = scmp.lt.s32.totalorder %s536_s6, %s536_s6 }
  0x3c   :  { %64 = vadd.xlane.f32.xlu0 %v61_v2  ;;  %94 = vadd.xlane.f32.xlu1 %v91_v3  ;;  %v455_v30 = vld [vmem:[#allocation7 + $0x60] sm:$0xff]   ;;  %v457_v32 = vld [vmem:[#allocation7 + $0x68] sm:$0xff]   ;;  %v458_v33 = vld [vmem:[#allocation7 + $0x30] sm:$0xff]  }
  0x3d   :  { %432 = vmatprep.mubr.msk.bf16.mxu1 %vm572_vm0, %v571_v6  ;;  %412 = vmatprep.mubr.msk.bf16.mxu0 %vm572_vm0, %v571_v6  ;;  %v459_v34 = vld [vmem:[#allocation7 + $0x70] sm:$0xff]   ;;  %v460_v35 = vld [vmem:[#allocation7 + $0x38] sm:$0xff]   ;;  %p543_p13 = por %p542_p12, %p541_p11 }
  0x3e   :  { %419 = vmatpush3.bf16.msra.mxu1 %v448_v7  ;;  %399 = vmatpush3.bf16.msra.mxu0 %v449_v24  ;;  %v461_v36 = vld [vmem:[#allocation7 + $0x78] sm:$0xff]  }
  0x3f   :  { %420 = vmatprep.subr.bf16.mxu1 %v571_v6  ;;  %400 = vmatprep.subr.bf16.mxu0 %v571_v6  ;;  %p544_p0 = pnand %p543_p13, %p537_p10 }
  0x42   :  { %421 = vmatpush3.bf16.msra.mxu1 %v450_v25  ;;  %401 = vmatpush3.bf16.msra.mxu0 %v451_v26 }
  0x43   :  { %422 = vmatprep.subr.bf16.mxu1 %v571_v6  ;;  %402 = vmatprep.subr.bf16.mxu0 %v571_v6 }
  0x46   :  { %423 = vmatpush3.bf16.msra.mxu1 %v452_v27  ;;  %403 = vmatpush3.bf16.msra.mxu0 %v453_v28 }
  0x47   :  { %424 = vmatprep.subr.bf16.mxu1 %v571_v6  ;;  %404 = vmatprep.subr.bf16.mxu0 %v571_v6 }
  0x4a   :  { %425 = vmatpush3.bf16.msra.mxu1 %v454_v29  ;;  %405 = vmatpush3.bf16.msra.mxu0 %v455_v30 }
  0x4b   :  { %426 = vmatprep.subr.bf16.mxu1 %v571_v6  ;;  %406 = vmatprep.subr.bf16.mxu0 %v571_v6 }
  0x4e   :  { %427 = vmatpush3.bf16.msra.mxu1 %v456_v31  ;;  %407 = vmatpush3.bf16.msra.mxu0 %v457_v32 }
  0x4f   :  { %428 = vmatprep.subr.bf16.mxu1 %v571_v6  ;;  %408 = vmatprep.subr.bf16.mxu0 %v571_v6 }
  0x52   :  { %429 = vmatpush3.bf16.msra.mxu1 %v458_v33  ;;  %409 = vmatpush3.bf16.msra.mxu0 %v459_v34 }
  0x53   :  { %430 = vmatprep.subr.bf16.mxu1 %v571_v6  ;;  %410 = vmatprep.subr.bf16.mxu0 %v571_v6 }
  0x56   :  { %431 = vmatpush3.bf16.msra.mxu1 %v460_v35  ;;  %411 = vmatpush3.bf16.msra.mxu0 %v461_v36 }
  0xc5   :  { %v63_v8 = vpop.xlane.xlu0 %62  ;;  %v93_v9 = vpop.xlane.xlu1 %92 }
  0xc6   :  { %v66_v10 = vmul.f32 0.03125, %v63_v8  ;;  %v96_v11 = vmul.f32 0.0625, %v93_v9 }
  0xc8   :  { %v653_v12 = vsub.f32 %v60_v0, %v66_v10  ;;  %v655_v13 = vsub.f32 %v90_v1, %v96_v11  ;;  %v76_v37 = vmul.f32 %v66_v10, %v66_v10  ;;  %v106_v38 = vmul.f32 %v96_v11, %v96_v11 }
  0xc9   :  { %v65_v14 = vpop.xlane.xlu0 %64  ;;  %v95_v15 = vpop.xlane.xlu1 %94 }
  0xca   :  { %v67_v16 = vmul.f32 0.03125, %v65_v14  ;;  %v70_v17 = vmul.f32 %v653_v12, %v653_v12  ;;  %v97_v18 = vmul.f32 0.0625, %v95_v15  ;;  %v100_v21 = vmul.f32 %v655_v13, %v655_v13 }
  0xcb   :  { %v78_v40 = vmul.f32 96.0, %v76_v37  ;;  %v108_v46 = vmul.f32 112.0, %v106_v38 }
  0xcc   :  { %v659_v19 = vsub.f32 %v61_v2, %v67_v16  ;;  %72 = vadd.xlane.f32.xlu0 %v70_v17  ;;  %v661_v20 = vsub.f32 %v91_v3, %v97_v18  ;;  %v77_v39 = vmul.f32 %v67_v16, %v67_v16  ;;  %v107_v43 = vmul.f32 %v97_v18, %v97_v18 }
  0xce   :  { %v71_v22 = vmul.f32 %v659_v19, %v659_v19  ;;  %v101_v23 = vmul.f32 %v661_v20, %v661_v20  ;;  %v79_v45 = vmul.f32 96.0, %v77_v39  ;;  %v109_v54 = vmul.f32 112.0, %v107_v43 }
  0xd0   :  { %102 = vadd.xlane.f32.xlu0 %v100_v21  ;;  %74 = vadd.xlane.f32.xlu1 %v71_v22 }
  0xd4   :  { %104 = vadd.xlane.f32.xlu1 %v101_v23 }
 0x159   :  { %v73_v41 = vpop.xlane.xlu0 %72 }
 0x15a   :  { %v80_v42 = vsub.f32 %v73_v41, %v78_v40 }
 0x15c   :  { %v82_v44 = vmul.f32 0.03125, %v80_v42 }
 0x15d   :  { %v75_v47 = vpop.xlane.xlu1 %74  ;;  %v103_v48 = vpop.xlane.xlu0 %102 }
 0x15e   :  { %v84_v49 = vadd.f32 1e-05, %v82_v44  ;;  %v81_v50 = vsub.f32 %v75_v47, %v79_v45  ;;  %v110_v51 = vsub.f32 %v103_v48, %v108_v46 }
 0x160   :  { %v83_v52 = vmul.f32 0.03125, %v81_v50  ;;  %v112_v53 = vmul.f32 0.0625, %v110_v51  ;;  %462 = vrsqrt.f32 %v84_v49 }
 0x161   :  { %v105_v55 = vpop.xlane.xlu1 %104 }
 0x162   :  { %v85_v56 = vadd.f32 1e-05, %v83_v52  ;;  %v114_v57 = vadd.f32 1e-05, %v112_v53  ;;  %v111_v58 = vsub.f32 %v105_v55, %v109_v54 }
 0x164   :  { %464 = vrsqrt.f32 %v85_v56  ;;  %v113_v59 = vmul.f32 0.0625, %v111_v58 }
 0x165   :  { %466 = vrsqrt.f32 %v114_v57 }
 0x166   :  { %v115_v60 = vadd.f32 1e-05, %v113_v59 }
 0x168   :  { %468 = vrsqrt.f32 %v115_v60 }
 0x16a   :  { %v463_v61 = vpop.eup %462 }
 0x16b   :  { %v88_v63 = vmul.f32 %v463_v61, %v653_v12  ;;  %v377_v12 = vld [vmem:[%s707_s3] ss:$0 sm:$0xff] }
 0x16e   :  { %v465_v62 = vpop.eup %464 }
 0x16f   :  { %v89_v0 = vmul.f32 %v465_v62, %v659_v19  ;;  %v467_v1 = vpop.eup %466 }
 0x170   :  { %v118_v4 = vmul.f32 %v467_v1, %v655_v13 }
 0x171   :  { %v120_v2 = vpack.c.bf16 %v89_v0, %v88_v63 }
 0x172   :  { %v469_v3 = vpop.eup %468 }
 0x173   :  { %433 = vmatmul.mubr.bf16.vlgmr.msra.gmra.mrb[0].mxu1 %v120_v2  ;;  %v119_v5 = vmul.f32 %v469_v3, %v661_v20 }
 0x175   :  { %v137_v6 = vpack.c.bf16 %v119_v5, %v118_v4 }
 0x177   :  { %413 = vmatmul.mubr.bf16.vlgmr.msra.gmra.mrb[0].mxu0 %v137_v6 }
 0x246   :  { %v325_v7 = vpop.f32.mrb[0].mxu1 }
 0x247   :  { %v434_v8 = vpop.f32.mrb[1].mxu1 }
 0x248   :  { %v328_v9 = vpop.f32.mrb[2].mxu1 }
 0x249   :  { %v435_v10 = vpop.f32.mrb[3].mxu1 }
 0x24a   :  { %v236_v11 = vpop.f32.mrb[0].mxu0 }
 0x24b   :  { %v326_v14 = vadd.f32 %v325_v7, %v236_v11  ;;  %v414_v15 = vpop.f32.mrb[1].mxu0 }
 0x24c   :  { %v239_v16 = vpop.f32.mrb[2].mxu0 }
 0x24d   :  { %v339_v17 = vadd.f32 %v377_v12, %v326_v14  ;;  %v329_v13 = vadd.f32 %v328_v9, %v239_v16  ;;  %v415_v18 = vpop.f32.mrb[3].mxu0 }
 0x24f   :  { %341 = vst [vmem:[#allocation8] sm:$0xff] %v339_v17  ;;  %v340_v19 = vadd.f32 %v377_v12, %v329_v13 }
 0x251   :  { %342 = vst [vmem:[#allocation8 + $0x8] sm:$0xff] %v340_v19 }
 0x252   :  { %547 = shalt.err (!%p544_p0)
}
 0x253   :  { %s548_s8 = scalar_lea.hbm %s708_s4, 256 }
 0x254   :  { %p549_p1 = scmp.ne.s32.totalorder %s708_s4, %s548_s8  ;;  %p552_p2 = scmp.lt.u32.totalorder %s548_s8, %s708_s4 }
 0x256   :  { %p554_p3 = pnand %p552_p2, %p549_p1 }
 0x258   :  { %557 = shalt.err (!%p554_p3)
}
 0x259   :  { %354 = dma.vmem_to_hbm [thread:$0]  %s349_s5, 256, %s708_s4, [#allocation4], %s566_s27, %s566_s27, %s567_s28  }
 0x25a   :  { %562 = dma.done.wait [#allocation4], 256  }
 0x25b   :  { %563 = vsyncadd [#allocation4], 4294967040 }
 0x25c   :  { %358 = vsyncpa [#allocation3], 1 }
 0x25d   :  { %359 = vsyncpa [#allocation6], 1 }
 0x25e   :  { %360 = vsyncpa [#allocation4], 1 }

// kernel: tpu_custom_call.1
= control target key start
LH: loop header
LB: loop body
LE: loop exit
PB: predicated region body
PF: predicated region fallthrough
CT: control target
= control target key end

     0   :  { %9 = vsyncpa [#allocation3], 0  ;;  %s704_s0 = inlined_call_operand.hbm [shape: f32[16,128], index: 0, kind: input, shape index: {}]   ;;  %s705_s1 = inlined_call_operand.hbm [shape: f32[16,128], index: 1, kind: input, shape index: {}]   ;;  %s706_s2 = inlined_call_operand.hbm [shape: bf16[256,128], index: 2, kind: input, shape index: {}]   ;;  %s707_s3 = inlined_call_operand.vmem [shape: f32[1,128], index: 3, kind: input, shape index: {}]   ;;  %s708_s4 = inlined_call_operand.hbm [shape: f32[16,128], index: 4, kind: output, shape index: {}]  }
   0x1   :  { %10 = vsyncpa [#allocation6], 0 }
   0x2   :  { %11 = vsyncpa [#allocation4], 0  ;;  %s564_s15 = smov [#allocation5]   ;;  %s565_s17 = smov [#allocation2]  }
   0x3   :  { %s29_s16 = sshll.u32 %s564_s15, 4  ;;  %s17_s18 = sshll.u32 %s565_s17, 4  ;;  %s30_s16 = int_to_ptr.vmem [resolvable:$true] %s29_s16  ;;  %s599_s18 = int_to_ptr.vmem [resolvable:$true] %s17_s18 }
   0x4   :  { %s470_s21 = scalar_lea.hbm %s705_s1, 256 }
   0x5   :  { %p471_p0 = scmp.ne.s32.totalorder %s705_s1, %s470_s21  ;;  %p474_p1 = scmp.lt.u32.totalorder %s470_s21, %s705_s1 }
   0x7   :  { %p476_p2 = pnand %p474_p1, %p471_p0 }
   0x9   :  { %479 = shalt.err (!%p476_p2)
}
   0xa   :  { %s480_s26 = scalar_lea.vmem %s30_s16, 256  ;;  %p485_p4 = scmp.lt.s32.totalorder %s30_s16, %s30_s16 }
   0xb   :  { %p481_p3 = scmp.ne.s32.totalorder %s30_s16, %s480_s26  ;;  %p486_p5 = scmp.lt.s32.totalorder %s480_s26, %s480_s26 }
   0xd   :  { %p487_p6 = por %p486_p5, %p485_p4 }
   0xf   :  { %p488_p7 = pnand %p487_p6, %p481_p3 }
  0x11   :  { %491 = shalt.err (!%p488_p7)
}
  0x12   :  { %s566_s27 = smov 128   ;;  %s567_s28 = smov 8  }
  0x13   :  { %35 = dma.hbm_to_vmem [thread:$0]  %s705_s1, 256, %s30_s16, [#allocation6], %s566_s27, %s566_s27, %s567_s28  }
  0x14   :  { %s492_s7 = scalar_lea.hbm %s704_s0, 256 }
  0x15   :  { %p493_p8 = scmp.ne.s32.totalorder %s704_s0, %s492_s7  ;;  %p496_p9 = scmp.lt.u32.totalorder %s492_s7, %s704_s0 }
  0x17   :  { %p498_p10 = pnand %p496_p9, %p493_p8 }
  0x19   :  { %501 = shalt.err (!%p498_p10)
}
  0x1a   :  { %s502_s12 = scalar_lea.vmem %s599_s18, 256  ;;  %p507_p12 = scmp.lt.s32.totalorder %s599_s18, %s599_s18 }
  0x1b   :  { %p503_p11 = scmp.ne.s32.totalorder %s599_s18, %s502_s12  ;;  %p508_p13 = scmp.lt.s32.totalorder %s502_s12, %s502_s12 }
  0x1d   :  { %p509_p0 = por %p508_p13, %p507_p12 }
  0x1f   :  { %p510_p1 = pnand %p509_p0, %p503_p11 }
  0x21   :  { %513 = shalt.err (!%p510_p1)
}
  0x22   :  { %23 = dma.hbm_to_vmem [thread:$0]  %s704_s0, 256, %s599_s18, [#allocation3], %s566_s27, %s566_s27, %s567_s28  }
  0x23   :  { %s568_s14 = smov [#allocation7]   ;;  %s514_s19 = scalar_lea.hbm %s706_s2, 2048 }
  0x24   :  { %s41_s15 = sshll.u32 %s568_s14, 4  ;;  %p515_p2 = scmp.ne.s32.totalorder %s706_s2, %s514_s19  ;;  %s42_s15 = int_to_ptr.vmem [resolvable:$true] %s41_s15 }
  0x25   :  { %p518_p3 = scmp.lt.u32.totalorder %s514_s19, %s706_s2 }
  0x27   :  { %p520_p4 = pnand %p518_p3, %p515_p2 }
  0x29   :  { %523 = shalt.err (!%p520_p4)
}
  0x2a   :  { %s524_s24 = scalar_lea.vmem %s42_s15, 2048  ;;  %p529_p6 = scmp.lt.s32.totalorder %s42_s15, %s42_s15 }
  0x2b   :  { %p525_p5 = scmp.ne.s32.totalorder %s42_s15, %s524_s24  ;;  %p530_p7 = scmp.lt.s32.totalorder %s524_s24, %s524_s24 }
  0x2d   :  { %p531_p8 = por %p530_p7, %p529_p6 }
  0x2f   :  { %p532_p9 = pnand %p531_p8, %p525_p5 }
  0x31   :  { %535 = shalt.err (!%p532_p9)
}
  0x32   :  { %s569_s0 = smov 64   ;;  %s570_s18 = smov 4  }
  0x33   :  { %47 = dma.hbm_to_vmem [thread:$0]  %s706_s2, 2048, %s42_s15, [#allocation6], %s569_s0, %s569_s0, %s570_s18  }
  0x34   :  { %558 = dma.done.wait [#allocation3], 256  }
  0x35   :  { %559 = vsyncadd [#allocation3], 4294967040 }
  0x36   :  { %560 = dma.done.wait [#allocation6], 2304  }
  0x37   :  { %561 = vsyncadd [#allocation6], 4294964992  ;;  %v60_v0 = vld [vmem:[#allocation2] sm:$0xff]  ;;  %v90_v1 = vld [vmem:[#allocation5] sm:$0xff]  ;;  %v571_v6 = vmov 0.0   ;;  %vm572_vm0 = vmmov 0  }
  0x38   :  { %v61_v2 = vld [vmem:[#allocation2 + $0x8] sm:$0xff]  ;;  %62 = vadd.xlane.f32.xlu0 %v60_v0  ;;  %92 = vadd.xlane.f32.xlu1 %v90_v1  ;;  %v91_v3 = vld [vmem:[#allocation5 + $0x8] sm:$0xff]  ;;  %v446_v4 = vld [vmem:[#allocation7] sm:$0xff]   ;;  %s573_s30 = smov [#allocation8]  }
  0x39   :  { %v447_v5 = vld [vmem:[#allocation7 + $0x40] sm:$0xff]   ;;  %416 = vmatprep.subr.bf16.mxu1 %v571_v6  ;;  %396 = vmatprep.subr.bf16.mxu0 %v571_v6  ;;  %v448_v7 = vld [vmem:[#allocation7 + $0x8] sm:$0xff]   ;;  %v450_v25 = vld [vmem:[#allocation7 + $0x10] sm:$0xff]   ;;  %s348_s5 = sshll.u32 %s573_s30, 4  ;;  %s349_s5 = int_to_ptr.vmem [resolvable:$true] %s348_s5 }
  0x3a   :  { %417 = vmatpush3.bf16.msra.mxu1 %v446_v4  ;;  %397 = vmatpush3.bf16.msra.mxu0 %v447_v5  ;;  %v449_v24 = vld [vmem:[#allocation7 + $0x48] sm:$0xff]   ;;  %v451_v26 = vld [vmem:[#allocation7 + $0x50] sm:$0xff]   ;;  %v452_v27 = vld [vmem:[#allocation7 + $0x18] sm:$0xff]   ;;  %s536_s6 = scalar_lea.vmem %s349_s5, 256  ;;  %p541_p11 = scmp.lt.s32.totalorder %s349_s5, %s349_s5 }
  0x3b   :  { %418 = vmatprep.subr.bf16.mxu1 %v571_v6  ;;  %398 = vmatprep.subr.bf16.mxu0 %v571_v6  ;;  %v453_v28 = vld [vmem:[#allocation7 + $0x58] sm:$0xff]   ;;  %v454_v29 = vld [vmem:[#allocation7 + $0x20] sm:$0xff]   ;;  %v456_v31 = vld [vmem:[#allocation7 + $0x28] sm:$0xff]   ;;  %p537_p10 = scmp.ne.s32.totalorder %s349_s5, %s536_s6  ;;  %p542_p12 = scmp.lt.s32.totalorder %s536_s6, %s536_s6 }
  0x3c   :  { %64 = vadd.xlane.f32.xlu0 %v61_v2  ;;  %94 = vadd.xlane.f32.xlu1 %v91_v3  ;;  %v455_v30 = vld [vmem:[#allocation7 + $0x60] sm:$0xff]   ;;  %v457_v32 = vld [vmem:[#allocation7 + $0x68] sm:$0xff]   ;;  %v458_v33 = vld [vmem:[#allocation7 + $0x30] sm:$0xff]  }
  0x3d   :  { %432 = vmatprep.mubr.msk.bf16.mxu1 %vm572_vm0, %v571_v6  ;;  %412 = vmatprep.mubr.msk.bf16.mxu0 %vm572_vm0, %v571_v6  ;;  %v459_v34 = vld [vmem:[#allocation7 + $0x70] sm:$0xff]   ;;  %v460_v35 = vld [vmem:[#allocation7 + $0x38] sm:$0xff]   ;;  %p543_p13 = por %p542_p12, %p541_p11 }
  0x3e   :  { %419 = vmatpush3.bf16.msra.mxu1 %v448_v7  ;;  %399 = vmatpush3.bf16.msra.mxu0 %v449_v24  ;;  %v461_v36 = vld [vmem:[#allocation7 + $0x78] sm:$0xff]  }
  0x3f   :  { %420 = vmatprep.subr.bf16.mxu1 %v571_v6  ;;  %400 = vmatprep.subr.bf16.mxu0 %v571_v6  ;;  %p544_p0 = pnand %p543_p13, %p537_p10 }
  0x42   :  { %421 = vmatpush3.bf16.msra.mxu1 %v450_v25  ;;  %401 = vmatpush3.bf16.msra.mxu0 %v451_v26 }
  0x43   :  { %422 = vmatprep.subr.bf16.mxu1 %v571_v6  ;;  %402 = vmatprep.subr.bf16.mxu0 %v571_v6 }
  0x46   :  { %423 = vmatpush3.bf16.msra.mxu1 %v452_v27  ;;  %403 = vmatpush3.bf16.msra.mxu0 %v453_v28 }
  0x47   :  { %424 = vmatprep.subr.bf16.mxu1 %v571_v6  ;;  %404 = vmatprep.subr.bf16.mxu0 %v571_v6 }
  0x4a   :  { %425 = vmatpush3.bf16.msra.mxu1 %v454_v29  ;;  %405 = vmatpush3.bf16.msra.mxu0 %v455_v30 }
  0x4b   :  { %426 = vmatprep.subr.bf16.mxu1 %v571_v6  ;;  %406 = vmatprep.subr.bf16.mxu0 %v571_v6 }
  0x4e   :  { %427 = vmatpush3.bf16.msra.mxu1 %v456_v31  ;;  %407 = vmatpush3.bf16.msra.mxu0 %v457_v32 }
  0x4f   :  { %428 = vmatprep.subr.bf16.mxu1 %v571_v6  ;;  %408 = vmatprep.subr.bf16.mxu0 %v571_v6 }
  0x52   :  { %429 = vmatpush3.bf16.msra.mxu1 %v458_v33  ;;  %409 = vmatpush3.bf16.msra.mxu0 %v459_v34 }
  0x53   :  { %430 = vmatprep.subr.bf16.mxu1 %v571_v6  ;;  %410 = vmatprep.subr.bf16.mxu0 %v571_v6 }
  0x56   :  { %431 = vmatpush3.bf16.msra.mxu1 %v460_v35  ;;  %411 = vmatpush3.bf16.msra.mxu0 %v461_v36 }
  0xc5   :  { %v63_v8 = vpop.xlane.xlu0 %62  ;;  %v93_v9 = vpop.xlane.xlu1 %92 }
  0xc6   :  { %v66_v10 = vmul.f32 0.03125, %v63_v8  ;;  %v96_v11 = vmul.f32 0.0625, %v93_v9 }
  0xc8   :  { %v653_v12 = vsub.f32 %v60_v0, %v66_v10  ;;  %v655_v13 = vsub.f32 %v90_v1, %v96_v11  ;;  %v76_v37 = vmul.f32 %v66_v10, %v66_v10  ;;  %v106_v38 = vmul.f32 %v96_v11, %v96_v11 }
  0xc9   :  { %v65_v14 = vpop.xlane.xlu0 %64  ;;  %v95_v15 = vpop.xlane.xlu1 %94 }
  0xca   :  { %v67_v16 = vmul.f32 0.03125, %v65_v14  ;;  %v70_v17 = vmul.f32 %v653_v12, %v653_v12  ;;  %v97_v18 = vmul.f32 0.0625, %v95_v15  ;;  %v100_v21 = vmul.f32 %v655_v13, %v655_v13 }
  0xcb   :  { %v78_v40 = vmul.f32 96.0, %v76_v37  ;;  %v108_v46 = vmul.f32 112.0, %v106_v38 }
  0xcc   :  { %v659_v19 = vsub.f32 %v61_v2, %v67_v16  ;;  %72 = vadd.xlane.f32.xlu0 %v70_v17  ;;  %v661_v20 = vsub.f32 %v91_v3, %v97_v18  ;;  %v77_v39 = vmul.f32 %v67_v16, %v67_v16  ;;  %v107_v43 = vmul.f32 %v97_v18, %v97_v18 }
  0xce   :  { %v71_v22 = vmul.f32 %v659_v19, %v659_v19  ;;  %v101_v23 = vmul.f32 %v661_v20, %v661_v20  ;;  %v79_v45 = vmul.f32 96.0, %v77_v39  ;;  %v109_v54 = vmul.f32 112.0, %v107_v43 }
  0xd0   :  { %102 = vadd.xlane.f32.xlu0 %v100_v21  ;;  %74 = vadd.xlane.f32.xlu1 %v71_v22 }
  0xd4   :  { %104 = vadd.xlane.f32.xlu1 %v101_v23 }
 0x159   :  { %v73_v41 = vpop.xlane.xlu0 %72 }
 0x15a   :  { %v80_v42 = vsub.f32 %v73_v41, %v78_v40 }
 0x15c   :  { %v82_v44 = vmul.f32 0.03125, %v80_v42 }
 0x15d   :  { %v75_v47 = vpop.xlane.xlu1 %74  ;;  %v103_v48 = vpop.xlane.xlu0 %102 }
 0x15e   :  { %v84_v49 = vadd.f32 1e-05, %v82_v44  ;;  %v81_v50 = vsub.f32 %v75_v47, %v79_v45  ;;  %v110_v51 = vsub.f32 %v103_v48, %v108_v46 }
 0x160   :  { %v83_v52 = vmul.f32 0.03125, %v81_v50  ;;  %v112_v53 = vmul.f32 0.0625, %v110_v51  ;;  %462 = vrsqrt.f32 %v84_v49 }
 0x161   :  { %v105_v55 = vpop.xlane.xlu1 %104 }
 0x162   :  { %v85_v56 = vadd.f32 1e-05, %v83_v52  ;;  %v114_v57 = vadd.f32 1e-05, %v112_v53  ;;  %v111_v58 = vsub.f32 %v105_v55, %v109_v54 }
 0x164   :  { %464 = vrsqrt.f32 %v85_v56  ;;  %v113_v59 = vmul.f32 0.0625, %v111_v58 }
 0x165   :  { %466 = vrsqrt.f32 %v114_v57 }
 0x166   :  { %v115_v60 = vadd.f32 1e-05, %v113_v59 }
 0x168   :  { %468 = vrsqrt.f32 %v115_v60 }
 0x16a   :  { %v463_v61 = vpop.eup %462 }
 0x16b   :  { %v88_v63 = vmul.f32 %v463_v61, %v653_v12  ;;  %v377_v12 = vld [vmem:[%s707_s3] ss:$0 sm:$0xff] }
 0x16e   :  { %v465_v62 = vpop.eup %464 }
 0x16f   :  { %v89_v0 = vmul.f32 %v465_v62, %v659_v19  ;;  %v467_v1 = vpop.eup %466 }
 0x170   :  { %v118_v4 = vmul.f32 %v467_v1, %v655_v13 }
 0x171   :  { %v120_v2 = vpack.c.bf16 %v89_v0, %v88_v63 }
 0x172   :  { %v469_v3 = vpop.eup %468 }
 0x173   :  { %433 = vmatmul.mubr.bf16.vlgmr.msra.gmra.mrb[0].mxu1 %v120_v2  ;;  %v119_v5 = vmul.f32 %v469_v3, %v661_v20 }
 0x175   :  { %v137_v6 = vpack.c.bf16 %v119_v5, %v118_v4 }
 0x177   :  { %413 = vmatmul.mubr.bf16.vlgmr.msra.gmra.mrb[0].mxu0 %v137_v6 }
 0x246   :  { %v325_v7 = vpop.f32.mrb[0].mxu1 }
 0x247   :  { %v434_v8 = vpop.f32.mrb[1].mxu1 }
 0x248   :  { %v328_v9 = vpop.f32.mrb[2].mxu1 }
 0x249   :  { %v435_v10 = vpop.f32.mrb[3].mxu1 }
 0x24a   :  { %v236_v11 = vpop.f32.mrb[0].mxu0 }
 0x24b   :  { %v326_v14 = vadd.f32 %v325_v7, %v236_v11  ;;  %v414_v15 = vpop.f32.mrb[1].mxu0 }
 0x24c   :  { %v239_v16 = vpop.f32.mrb[2].mxu0 }
 0x24d   :  { %v339_v17 = vadd.f32 %v377_v12, %v326_v14  ;;  %v329_v13 = vadd.f32 %v328_v9, %v239_v16  ;;  %v415_v18 = vpop.f32.mrb[3].mxu0 }
 0x24f   :  { %341 = vst [vmem:[#allocation8] sm:$0xff] %v339_v17  ;;  %v340_v19 = vadd.f32 %v377_v12, %v329_v13 }
 0x251   :  { %342 = vst [vmem:[#allocation8 + $0x8] sm:$0xff] %v340_v19 }
 0x252   :  { %547 = shalt.err (!%p544_p0)
}
 0x253   :  { %s548_s8 = scalar_lea.hbm %s708_s4, 256 }
 0x254   :  { %p549_p1 = scmp.ne.s32.totalorder %s708_s4, %s548_s8  ;;  %p552_p2 = scmp.lt.u32.totalorder %s548_s8, %s708_s4 }
 0x256   :  { %p554_p3 = pnand %p552_p2, %p549_p1 }
 0x258   :  { %557 = shalt.err (!%p554_p3)
}
 0x259   :  { %354 = dma.vmem_to_hbm [thread:$0]  %s349_s5, 256, %s708_s4, [#allocation4], %s566_s27, %s566_s27, %s567_s28  }
 0x25a   :  { %562 = dma.done.wait [#allocation4], 256  }
 0x25b   :  { %563 = vsyncadd [#allocation4], 4294967040 }
 0x25c   :  { %358 = vsyncpa [#allocation3], 1 }
 0x25d   :  { %359 = vsyncpa [#allocation6], 1 }
 0x25e   :  { %360 = vsyncpa [#allocation4], 1 }

</bundles_post_ra>
